<compile_context>
chip_gen: v7x
topology: tpu7x:2x2x1
jax: 0.10.0
libtpu: 0.0.40
codegen_flags: <defaults>
</compile_context>

<pallas_src>
import jax
import jax.numpy as jnp
from jax.experimental import pallas as pl
from jax.experimental.pallas import tpu as pltpu


def _sigmoid_kernel(x_ref, o_ref):
    # Elementwise sigmoid on the current VMEM tile (VPU + EUP transcendental).
    o_ref[...] = jax.nn.sigmoid(x_ref[...])


def _choose_width(n: int):
    """Pick a lane-dense last dim W (multiple of 128).

    Prefer the widest W that divides n exactly (zero-copy reshape, no padding);
    fall back to W=128 with minimal flat padding otherwise.
    """
    for w in (1024, 512, 256, 128):
        if n % w == 0:
            return w, 0
    w = 128
    pad = (-n) % w
    return w, pad


def sigmoid_pallas(x: jax.Array) -> jax.Array:
    """Applies sigmoid elementwise via a pipelined Pallas TPU kernel."""
    orig_shape = x.shape
    dtype = x.dtype
    n = x.size
    itemsize = jnp.dtype(dtype).itemsize

    W, pad = _choose_width(n)

    flat = jnp.ravel(x)
    if pad:
        # Only materialized in the rare unaligned case (single jnp.pad op).
        flat = jnp.pad(flat, (0, pad))
    n_work = n + pad
    rows = n_work // W

    # ~2 MiB blocks: big enough to amortize per-step overhead and reach the
    # HBM roofline, small enough (4 buffers ~ 8 MiB) for every generation's
    # scoped VMEM default (v5e 16 MiB, v6e/v7x 32 MiB).
    target_block_bytes = 2 * 1024 * 1024
    cap_rows = max(8, (target_block_bytes // (W * itemsize)) // 8 * 8)
    if rows <= cap_rows:
        block_rows = rows          # full extent along rows -> always legal
    else:
        block_rows = cap_rows      # multiple of 8 -> legal; last block masked
    grid_steps = pl.cdiv(rows, block_rows)

    slab = flat.reshape(rows, W)

    out = pl.pallas_call(
        _sigmoid_kernel,
        out_shape=jax.ShapeDtypeStruct((rows, W), dtype),
        grid_spec=pl.GridSpec(
            grid=(grid_steps,),
            in_specs=[pl.BlockSpec((block_rows, W), lambda i: (i, 0))],
            out_specs=pl.BlockSpec((block_rows, W), lambda i: (i, 0)),
        ),
        compiler_params=pltpu.CompilerParams(
            dimension_semantics=("parallel",),
        ),
        cost_estimate=pl.CostEstimate(
            flops=4 * n_work,
            transcendentals=n_work,
            bytes_accessed=2 * n_work * itemsize,
        ),
    )(slab)

    if pad:
        return out.reshape(-1)[:n].reshape(orig_shape)
    return out.reshape(orig_shape)


if __name__ == "__main__":
    # --- Example 1: the literal tensor from the reference script ---
    inp_small = jnp.array([[1.0, -0.5], [-1.0, 3.0]], dtype=jnp.float32)
    inp_small = inp_small.reshape(-1, 1, 2, 2)  # (1, 1, 2, 2), NCHW

    out_small = jax.block_until_ready(sigmoid_pallas(inp_small))
    ref_small = jax.nn.sigmoid(inp_small)
    assert out_small.shape == (1, 1, 2, 2)
    assert jnp.allclose(out_small, ref_small, atol=1e-6), "small-case mismatch"

    # --- Example 2: the NCHW activation shape implied by the module ---
    key = jax.random.PRNGKey(0)
    x = jax.random.normal(key, (2, 4, 16, 16), dtype=jnp.float32)

    out = jax.block_until_ready(sigmoid_pallas(x))
    ref = jax.nn.sigmoid(x)
    assert out.shape == x.shape and out.dtype == x.dtype
    assert jnp.allclose(out, ref, atol=1e-6), "large-case mismatch"

    # --- Example 3: shape that exercises the multi-step pipelined grid and
    #     the masked partial last block (rows = 514 -> grid of 2 blocks) ---
    key2 = jax.random.PRNGKey(0)
    y = jax.random.normal(key2, (2, 4, 256, 257), dtype=jnp.float32)

    out_y = jax.block_until_ready(sigmoid_pallas(y))
    ref_y = jax.nn.sigmoid(y)
    assert out_y.shape == y.shape and out_y.dtype == y.dtype
    assert jnp.allclose(out_y, ref_y, atol=1e-6), "pipelined-case mismatch"

    print("KERNEL_OK")
</pallas_src>

<mosaic_0001>
module attributes {stable_mosaic.version = 11 : i64} {
  func.func @_sigmoid_kernel(%arg0: i32, %arg1: memref<1x128xf32, #tpu.memory_space<vmem>>, %arg2: memref<1x128xf32, #tpu.memory_space<vmem>>) attributes {dimension_semantics = [#tpu.dimension_semantics<parallel>], iteration_bounds = array<i64: 1>, scalar_prefetch = 0 : i64, scratch_operands = 0 : i64, tpu.core_type = #tpu.core_type<tc>, window_params = [{transform_indices = @transform_0, window_bounds = array<i64: 1, 128>}, {transform_indices = @transform_1, window_bounds = array<i64: 1, 128>}]} {
    %c0 = arith.constant 0 : index
    %c0_0 = arith.constant 0 : index
    %0 = vector.load %arg1[%c0, %c0_0] : memref<1x128xf32, #tpu.memory_space<vmem>>, vector<1x128xf32>
    %1 = arith.negf %0 : vector<1x128xf32>
    %2 = math.exp %1 : vector<1x128xf32>
    %cst = arith.constant 1.000000e+00 : f32
    %3 = vector.broadcast %cst : f32 to vector<1x128xf32>
    %4 = arith.addf %3, %2 : vector<1x128xf32>
    %5 = arith.divf %3, %4 : vector<1x128xf32>
    %c0_1 = arith.constant 0 : index
    %c0_2 = arith.constant 0 : index
    %6 = vector.load %arg2[%c0_1, %c0_2] : memref<1x128xf32, #tpu.memory_space<vmem>>, vector<1x128xf32>
    tpu.vector_store %arg2[%c0_1, %c0_2], %5 {strides = array<i32>} : memref<1x128xf32, #tpu.memory_space<vmem>>, vector<1x128xf32>,
    return
  }
  func.func @transform_0(%arg0: i32) -> (i32, i32) {
    %c0_i32 = arith.constant 0 : i32
    %c0_i32_0 = arith.constant 0 : i32
    return %arg0, %c0_i32 : i32, i32
  }
  func.func @transform_1(%arg0: i32) -> (i32, i32) {
    %c0_i32 = arith.constant 0 : i32
    %c0_i32_0 = arith.constant 0 : i32
    return %arg0, %c0_i32 : i32, i32
  }
}

</mosaic_0001>

<bundles_post_ra>
// kernel: tpu_custom_call.1
= control target key start
LH: loop header
LB: loop body
LE: loop exit
PB: predicated region body
PF: predicated region fallthrough
CT: control target
= control target key end

     0   :  { %6 = vsyncpa [#allocation3], 0  ;;  %s135_s0 = inlined_call_operand.hbm [shape: f32[1,128], index: 0, kind: input, shape index: {}]   ;;  %s136_s1 = inlined_call_operand.hbm [shape: f32[1,128], index: 1, kind: output, shape index: {}]  }
   0x1   :  { %7 = vsyncpa [#allocation4], 0  ;;  %s99_s6 = smov [#allocation2]   ;;  %s51_s10 = scalar_lea.hbm %s135_s0, 16 }
   0x2   :  { %s14_s7 = sshll.u32 %s99_s6, 4  ;;  %p52_p0 = scmp.ne.s32.totalorder %s135_s0, %s51_s10  ;;  %s15_s7 = int_to_ptr.vmem [resolvable:$true] %s14_s7 }
   0x3   :  { %p55_p1 = scmp.lt.u32.totalorder %s51_s10, %s135_s0 }
   0x5   :  { %p57_p2 = pnand %p55_p1, %p52_p0 }
   0x7   :  { %60 = shalt.err (!%p57_p2)
}
   0x8   :  { %s61_s15 = scalar_lea.vmem %s15_s7, 16  ;;  %s65_s16 = scalar_lea.vmem %s15_s7, 32 }
   0x9   :  { %p62_p3 = scmp.ne.s32.totalorder %s15_s7, %s61_s15  ;;  %p66_p4 = scmp.lt.s32.totalorder %s15_s7, %s15_s7 }
   0xa   :  { %p67_p5 = scmp.lt.s32.totalorder %s65_s16, %s61_s15 }
   0xc   :  { %p68_p6 = por %p67_p5, %p66_p4 }
   0xe   :  { %p69_p7 = pnand %p68_p6, %p62_p3 }
  0x10   :  { %72 = shalt.err (!%p69_p7)
}
  0x11   :  { %17 = dma.hbm_to_vmem [thread:$0]  %s135_s0, 16, %s15_s7, [#allocation3]  }
  0x12   :  { %95 = dma.done.wait [#allocation3], 16  }
  0x13   :  { %96 = vsyncadd [#allocation3], 4294967280  ;;  %v21_v0 = vld [vmem:[#allocation2] sm:$0x1]  ;;  %s100_s19 = smov [#allocation5]  }
  0x14   :  { %v44_v1 = vmul.f32 -1.442695, %v21_v0  ;;  %s35_s20 = sshll.u32 %s100_s19, 4  ;;  %s36_s20 = int_to_ptr.vmem [resolvable:$true] %s35_s20 }
  0x15   :  { %s73_s21 = scalar_lea.vmem %s36_s20, 16  ;;  %s77_s22 = scalar_lea.vmem %s36_s20, 32 }
  0x16   :  { %47 = vpow2.f32 %v44_v1  ;;  %p74_p8 = scmp.ne.s32.totalorder %s36_s20, %s73_s21  ;;  %p78_p9 = scmp.lt.s32.totalorder %s36_s20, %s36_s20 }
  0x17   :  { %p79_p10 = scmp.lt.s32.totalorder %s77_s22, %s73_s21 }
  0x19   :  { %p80_p11 = por %p79_p10, %p78_p9 }
  0x1b   :  { %p81_p12 = pnand %p80_p11, %p74_p8 }
  0x20   :  { %v48_v2 = vpop.eup %47 }
  0x21   :  { %v25_v3 = vadd.f32 1.0, %v48_v2 }
  0x23   :  { %49 = vrcp.f32 %v25_v3 }
  0x2d   :  { %v50_v4 = vpop.eup %49 }
  0x2e   :  { %28 = vst [vmem:[#allocation5] sm:$0x1] %v50_v4 }
  0x2f   :  { %84 = shalt.err (!%p81_p12)
}
  0x30   :  { %s85_s24 = scalar_lea.hbm %s136_s1, 16 }
  0x31   :  { %p86_p13 = scmp.ne.s32.totalorder %s136_s1, %s85_s24  ;;  %p89_p0 = scmp.lt.u32.totalorder %s85_s24, %s136_s1 }
  0x33   :  { %p91_p1 = pnand %p89_p0, %p86_p13 }
  0x35   :  { %94 = shalt.err (!%p91_p1)
}
  0x36   :  { %38 = dma.vmem_to_hbm [thread:$0]  %s36_s20, 16, %s136_s1, [#allocation4]  }
  0x37   :  { %97 = dma.done.wait [#allocation4], 16  }
  0x38   :  { %98 = vsyncadd [#allocation4], 4294967280 }
  0x39   :  { %42 = vsyncpa [#allocation3], 1 }
  0x3a   :  { %43 = vsyncpa [#allocation4], 1 }

</bundles_post_ra>
